<compile_context>
chip_gen: v5e
topology: v5e:2x2
jax: 0.10.0
libtpu: 0.0.40
codegen_flags: <defaults>
</compile_context>

<pallas_src>
import numpy as np
import jax
import jax.numpy as jnp
from jax.experimental import pallas as pl
from jax.experimental.pallas import tpu as pltpu

_EPS = 1e-5


# --------------------------- trace-time weight prep ---------------------------

def _bn_affine(gamma, beta, mean, var):
    scale = gamma / jnp.sqrt(var + _EPS)
    shift = beta - mean * scale
    return scale, shift                       # (Cout,), (Cout,)


def _toeplitz_weight(w_hwio, W):
    """HWIO 3x3 'same' conv weight -> 3 block-Toeplitz matrices.

    Horizontal padding is folded INTO the weight, so the image only needs
    vertical zero padding and stays lane-aligned:

        y[h, w*Cout + co] = sum_dy  Xv[h + dy, :] @ out[dy]

    where Xv[r, w*Cin + ci] = x_padded_vertically[r, w, ci].
    Returns (3, W*Cin, W*Cout) float32.
    """
    kh, kw, cin, cout = w_hwio.shape
    pad = (kw - 1) // 2
    mats = []
    for dy in range(kh):
        m = jnp.zeros((W * cin, W * cout), jnp.float32)
        for dx in range(kw):
            sel = np.zeros((W, W), np.float32)
            for w in range(W):
                src = w + dx - pad
                if 0 <= src < W:
                    sel[src, w] = 1.0
            m = m + jnp.kron(jnp.asarray(sel), w_hwio[dy, dx].astype(jnp.float32))
        mats.append(m)
    return jnp.stack(mats)                    # (3, W*Cin, W*Cout)


# -------------------------------- fused kernel --------------------------------

def _make_kernel(Nb, H, W, Cin, Cout, scale_input):
    WC_in = W * Cin
    WC_out = W * Cout
    M = Nb * H

    def kernel(x_ref, w1_ref, b1_ref, w2_ref, b2_ref, *rest):
        if scale_input:
            bs_ref, o_ref, out1p_ref = rest
        else:
            o_ref, out1p_ref = rest

        # ---- layer1 (+ fused 1x1 residual): ONE MXU call.
        # LHS = three vertically shifted row windows concatenated along lanes;
        # RHS rows = [w1t(dy=0); w1t(dy=1) | residual block-diag; w1t(dy=2)].
        lhs1 = jnp.concatenate(
            [x_ref[:, dy:dy + H, :].reshape(M, WC_in) for dy in range(3)],
            axis=-1)                                            # (M, 3*WC_in) bf16
        acc1 = jnp.dot(lhs1, w1_ref[...],
                       preferred_element_type=jnp.float32)      # (M, WC_out[*2]) f32
        out1 = jnp.maximum(acc1[:, :WC_out] + b1_ref[...], 0.0)

        # ---- dropout(p=0.01): identity in eval mode.
        # TODO(synk): train-mode Dropout RNG masking and batch-statistic
        #             BatchNorm are not reproduced (eval semantics only).

        # ---- stage the intermediate in a bf16 VMEM halo scratch (never HBM).
        # Only the two halo rows are zeroed; the interior is overwritten anyway.
        zrow = jnp.zeros((Nb, 1, WC_out), jnp.bfloat16)
        out1p_ref[:, 0:1, :] = zrow                             # top halo
        out1p_ref[:, H + 1:H + 2, :] = zrow                     # bottom halo
        out1p_ref[:, 1:H + 1, :] = out1.reshape(Nb, H, WC_out).astype(jnp.bfloat16)

        # ---- layer2: ONE MXU call over lane-aligned 128-wide windows.
        lhs2 = jnp.concatenate(
            [out1p_ref[:, dy:dy + H, :].reshape(M, WC_out) for dy in range(3)],
            axis=-1)                                            # (M, 3*WC_out) bf16
        acc2 = jnp.dot(lhs2, w2_ref[...],
                       preferred_element_type=jnp.float32)      # (M, WC_out) f32
        y2 = jnp.maximum(acc2 + b2_ref[...], 0.0)

        # ---- residual path
        if scale_input:
            res = acc1[:, WC_out:] + bs_ref[...]                # 1x1 conv, fused above
        else:
            res = x_ref[:, 1:H + 1, :].reshape(M, WC_in).astype(jnp.float32)

        o_ref[...] = (y2 + res).reshape(Nb, H, WC_out).astype(o_ref.dtype)

    return kernel


# ------------------------------- module forward -------------------------------

def conv_block_forward(x_nhwc, params, scale_input=True, batch_tile=None):
    N, H, W, Cin = x_nhwc.shape
    Cout = params["w1"].shape[-1]
    WC_in, WC_out = W * Cin, W * Cout

    # How many images share one grid step (fills MXU M = Nb*H). Keep at least
    # 2 grid steps when N >= 2 so both TensorCores get work on v7x.
    if batch_tile is None:
        nb_cap = max(1, 256 // H)                       # target M up to ~256
        steps = max(min(N, 2), pl.cdiv(N, nb_cap))
        batch_tile = pl.cdiv(N, steps)
    Nb = batch_tile
    steps = pl.cdiv(N, Nb)
    N_pad = steps * Nb

    # Fold BatchNorm (running stats) into conv weights/bias, in f32.
    sc1, sh1 = _bn_affine(params["bn1_gamma"], params["bn1_beta"],
                          params["bn1_mean"], params["bn1_var"])
    sc2, sh2 = _bn_affine(params["bn2_gamma"], params["bn2_beta"],
                          params["bn2_mean"], params["bn2_var"])
    w1f = params["w1"] * sc1[None, None, None, :]
    w2f = params["w2"] * sc2[None, None, None, :]

    # Block-Toeplitz weights (horizontal 'same' padding folded in), K-stacked
    # so each layer is a single MXU call; fold in f32, cast to bf16 once.
    w1t = _toeplitz_weight(w1f, W)                      # (3, WC_in,  WC_out)
    w2t = _toeplitz_weight(w2f, W)                      # (3, WC_out, WC_out)
    w2_big = w2t.reshape(3 * WC_out, WC_out).astype(jnp.bfloat16)
    b1 = jnp.tile(sh1, W).reshape(1, WC_out).astype(jnp.float32)
    b2 = jnp.tile(sh2, W).reshape(1, WC_out).astype(jnp.float32)

    if scale_input:
        # 1x1 residual conv as a block-diagonal matmul, fused into the layer-1
        # RHS as extra output columns (dy=1 block rows only).
        ws_blk = jnp.kron(jnp.eye(W, dtype=jnp.float32),
                          params["ws"].astype(jnp.float32))     # (WC_in, WC_out)
        w1_big = jnp.zeros((3 * WC_in, 2 * WC_out), jnp.float32)
        w1_big = w1_big.at[:, :WC_out].set(w1t.reshape(3 * WC_in, WC_out))
        w1_big = w1_big.at[WC_in:2 * WC_in, WC_out:].set(ws_blk)
        w1_big = w1_big.astype(jnp.bfloat16)
        bs_b = jnp.tile(params["bs"], W).reshape(1, WC_out).astype(jnp.float32)
    else:
        assert Cin == Cout, "identity residual requires Cin == Cout"
        w1_big = w1t.reshape(3 * WC_in, WC_out).astype(jnp.bfloat16)

    # Vertically zero-padded input, (W, Cin) flattened into the lane dimension.
    xp = jnp.pad(x_nhwc, ((0, N_pad - N), (1, 1), (0, 0), (0, 0)))
    xp = xp.reshape(N_pad, H + 2, WC_in).astype(jnp.bfloat16)

    inputs = [xp, w1_big, b1, w2_big, b2]
    in_specs = [
        pl.BlockSpec((Nb, H + 2, WC_in), lambda n: (n, 0, 0)),
        pl.BlockSpec(w1_big.shape, lambda n: (0, 0)),
        pl.BlockSpec((1, WC_out), lambda n: (0, 0)),
        pl.BlockSpec((3 * WC_out, WC_out), lambda n: (0, 0)),
        pl.BlockSpec((1, WC_out), lambda n: (0, 0)),
    ]
    if scale_input:
        inputs.append(bs_b)
        in_specs.append(pl.BlockSpec((1, WC_out), lambda n: (0, 0)))

    out2 = pl.pallas_call(
        _make_kernel(Nb, H, W, Cin, Cout, scale_input),
        out_shape=jax.ShapeDtypeStruct((N_pad, H, WC_out), jnp.float32),
        grid=(steps,),
        in_specs=in_specs,
        out_specs=pl.BlockSpec((Nb, H, WC_out), lambda n: (n, 0, 0)),
        scratch_shapes=[pltpu.VMEM((Nb, H + 2, WC_out), jnp.bfloat16)],
        compiler_params=pltpu.CompilerParams(
            dimension_semantics=("parallel",)),
    )(*inputs)

    out = out2.reshape(N_pad, H, W, Cout)
    return out[:N] if N_pad != N else out


# ------------------------------ pure-JAX reference ------------------------------

def conv_block_reference(x_nhwc, params, scale_input=True):
    dn = ("NHWC", "HWIO", "NHWC")

    def cbr(x, w, g, b, m, v):
        y = jax.lax.conv_general_dilated(x, w, (1, 1), "SAME", dimension_numbers=dn,
                                         precision=jax.lax.Precision.HIGHEST)
        y = (y - m) / jnp.sqrt(v + _EPS) * g + b
        return jnp.maximum(y, 0.0)

    out = cbr(x_nhwc, params["w1"], params["bn1_gamma"], params["bn1_beta"],
              params["bn1_mean"], params["bn1_var"])
    out = cbr(out, params["w2"], params["bn2_gamma"], params["bn2_beta"],
              params["bn2_mean"], params["bn2_var"])
    if scale_input:
        residual = jnp.einsum("nhwc,cd->nhwd", x_nhwc, params["ws"]) + params["bs"]
    else:
        residual = x_nhwc
    return out + residual


# ------------------------------------ main ------------------------------------

if __name__ == "__main__":
    N, Cin, Cout, H, W = 2, 4, 8, 16, 16

    key = jax.random.PRNGKey(0)
    keys = jax.random.split(key, 10)

    # PyTorch input is NCHW; the kernels work in NHWC.
    x_nchw = jax.random.normal(keys[0], (N, Cin, H, W), jnp.float32)
    x_nhwc = jnp.transpose(x_nchw, (0, 2, 3, 1))

    params = dict(
        # cbrblock 1: Conv2d(Cin, Cout, 3, bias=False) + BatchNorm2d(Cout)
        w1=0.1 * jax.random.normal(keys[1], (3, 3, Cin, Cout), jnp.float32),
        bn1_gamma=1.0 + 0.1 * jax.random.normal(keys[2], (Cout,), jnp.float32),
        bn1_beta=0.1 * jax.random.normal(keys[3], (Cout,), jnp.float32),
        bn1_mean=jnp.zeros((Cout,), jnp.float32),   # fresh BatchNorm2d running stats
        bn1_var=jnp.ones((Cout,), jnp.float32),
        # cbrblock 2: Conv2d(Cout, Cout, 3, bias=False) + BatchNorm2d(Cout)
        w2=0.1 * jax.random.normal(keys[4], (3, 3, Cout, Cout), jnp.float32),
        bn2_gamma=1.0 + 0.1 * jax.random.normal(keys[5], (Cout,), jnp.float32),
        bn2_beta=0.1 * jax.random.normal(keys[6], (Cout,), jnp.float32),
        bn2_mean=jnp.zeros((Cout,), jnp.float32),
        bn2_var=jnp.ones((Cout,), jnp.float32),
        # scale: Conv2d(Cin, Cout, 1, bias=True)  -> (Cin, Cout) matrix + bias
        ws=0.1 * jax.random.normal(keys[7], (Cin, Cout), jnp.float32),
        bs=0.1 * jax.random.normal(keys[8], (Cout,), jnp.float32),
    )

    out = conv_block_forward(x_nhwc, params, scale_input=True)
    out = jax.block_until_ready(out)

    ref = conv_block_reference(x_nhwc, params, scale_input=True)
    assert out.shape == (N, H, W, Cout), out.shape
    err = float(jnp.abs(out - ref).max())
    assert jnp.allclose(out, ref, atol=2e-2, rtol=2e-2), err

    print("KERNEL_OK")
</pallas_src>

<mosaic_0001>
module attributes {stable_mosaic.version = 11 : i64} {
  func.func @kernel(%arg0: i32, %arg1: memref<1x18x64xbf16, #tpu.memory_space<vmem>>, %arg2: memref<192x256xbf16, #tpu.memory_space<vmem>>, %arg3: memref<1x128xf32, #tpu.memory_space<vmem>>, %arg4: memref<384x128xbf16, #tpu.memory_space<vmem>>, %arg5: memref<1x128xf32, #tpu.memory_space<vmem>>, %arg6: memref<1x128xf32, #tpu.memory_space<vmem>>, %arg7: memref<1x16x128xf32, #tpu.memory_space<vmem>>, %arg8: memref<1x18x128xbf16, #tpu.memory_space<vmem>>) attributes {dimension_semantics = [#tpu.dimension_semantics<parallel>], iteration_bounds = array<i64: 2>, scalar_prefetch = 0 : i64, scratch_operands = 1 : i64, tpu.core_type = #tpu.core_type<tc>, window_params = [{transform_indices = @transform_0, window_bounds = array<i64: 1, 18, 64>}, {pipeline_mode = #tpu.pipeline_mode<synchronous>, transform_indices = @transform_1, window_bounds = array<i64: 192, 256>}, {pipeline_mode = #tpu.pipeline_mode<synchronous>, transform_indices = @transform_2, window_bounds = array<i64: 1, 128>}, {pipeline_mode = #tpu.pipeline_mode<synchronous>, transform_indices = @transform_3, window_bounds = array<i64: 384, 128>}, {pipeline_mode = #tpu.pipeline_mode<synchronous>, transform_indices = @transform_4, window_bounds = array<i64: 1, 128>}, {pipeline_mode = #tpu.pipeline_mode<synchronous>, transform_indices = @transform_5, window_bounds = array<i64: 1, 128>}, {transform_indices = @transform_6, window_bounds = array<i64: 1, 16, 128>}]} {
    %c0 = arith.constant 0 : index
    %c0_0 = arith.constant 0 : index
    %c0_1 = arith.constant 0 : index
    %0 = vector.load %arg1[%c0, %c0_0, %c0_1] : memref<1x18x64xbf16, #tpu.memory_space<vmem>>, vector<1x16x64xbf16>
    %1 = vector.shape_cast %0 : vector<1x16x64xbf16> to vector<16x64xbf16>
    %c0_2 = arith.constant 0 : index
    %c1 = arith.constant 1 : index
    %c0_3 = arith.constant 0 : index
    %2 = vector.load %arg1[%c0_2, %c1, %c0_3] : memref<1x18x64xbf16, #tpu.memory_space<vmem>>, vector<1x16x64xbf16>
    %3 = vector.shape_cast %2 : vector<1x16x64xbf16> to vector<16x64xbf16>
    %c0_4 = arith.constant 0 : index
    %c2 = arith.constant 2 : index
    %c0_5 = arith.constant 0 : index
    %4 = vector.load %arg1[%c0_4, %c2, %c0_5] : memref<1x18x64xbf16, #tpu.memory_space<vmem>>, vector<1x16x64xbf16>
    %5 = vector.shape_cast %4 : vector<1x16x64xbf16> to vector<16x64xbf16>
    %6 = tpu.concatenate %1, %3, %5 in 1 : vector<16x64xbf16>, vector<16x64xbf16>, vector<16x64xbf16> -> vector<16x192xbf16>
    %c0_6 = arith.constant 0 : index
    %c0_7 = arith.constant 0 : index
    %7 = vector.load %arg2[%c0_6, %c0_7] : memref<192x256xbf16, #tpu.memory_space<vmem>>, vector<192x256xbf16>
    %cst = arith.constant dense<0.000000e+00> : vector<16x256xf32>
    %8 = tpu.matmul %6, %7, %cst {dimension_numbers = #tpu.dot_dimension_numbers<[1], [0], [0], [1], [0, 0, 1, 1], [], []>} : vector<16x192xbf16>, vector<192x256xbf16>, vector<16x256xf32> -> vector<16x256xf32>
    %9 = vector.extract_strided_slice %8 {offsets = [0, 0], sizes = [16, 128], strides = [1, 1]} : vector<16x256xf32> to vector<16x128xf32>
    %c0_8 = arith.constant 0 : index
    %c0_9 = arith.constant 0 : index
    %10 = vector.load %arg3[%c0_8, %c0_9] : memref<1x128xf32, #tpu.memory_space<vmem>>, vector<1x128xf32>
    %11 = vector.broadcast %10 : vector<1x128xf32> to vector<16x128xf32>
    %12 = arith.addf %9, %11 : vector<16x128xf32>
    %cst_10 = arith.constant 0.000000e+00 : f32
    %13 = vector.broadcast %cst_10 : f32 to vector<16x128xf32>
    %14 = arith.maximumf %12, %13 : vector<16x128xf32>
    %cst_11 = arith.constant 0.000000e+00 : bf16
    %15 = vector.broadcast %cst_11 : bf16 to vector<1x1x128xbf16>
    %c0_12 = arith.constant 0 : index
    %c0_13 = arith.constant 0 : index
    %c0_14 = arith.constant 0 : index
    %16 = vector.load %arg8[%c0_12, %c0_13, %c0_14] : memref<1x18x128xbf16, #tpu.memory_space<vmem>>, vector<1x1x128xbf16>
    tpu.vector_store %arg8[%c0_12, %c0_13, %c0_14], %15 {strides = array<i32>} : memref<1x18x128xbf16, #tpu.memory_space<vmem>>, vector<1x1x128xbf16>,
    %c0_15 = arith.constant 0 : index
    %c17 = arith.constant 17 : index
    %c0_16 = arith.constant 0 : index
    %17 = vector.load %arg8[%c0_15, %c17, %c0_16] : memref<1x18x128xbf16, #tpu.memory_space<vmem>>, vector<1x1x128xbf16>
    tpu.vector_store %arg8[%c0_15, %c17, %c0_16], %15 {strides = array<i32>} : memref<1x18x128xbf16, #tpu.memory_space<vmem>>, vector<1x1x128xbf16>,
    %18 = vector.shape_cast %14 : vector<16x128xf32> to vector<1x16x128xf32>
    %19 = arith.truncf %18 : vector<1x16x128xf32> to vector<1x16x128xbf16>
    %c0_17 = arith.constant 0 : index
    %c1_18 = arith.constant 1 : index
    %c0_19 = arith.constant 0 : index
    %20 = vector.load %arg8[%c0_17, %c1_18, %c0_19] : memref<1x18x128xbf16, #tpu.memory_space<vmem>>, vector<1x16x128xbf16>
    tpu.vector_store %arg8[%c0_17, %c1_18, %c0_19], %19 {strides = array<i32>} : memref<1x18x128xbf16, #tpu.memory_space<vmem>>, vector<1x16x128xbf16>,
    %c0_20 = arith.constant 0 : index
    %c0_21 = arith.constant 0 : index
    %c0_22 = arith.constant 0 : index
    %21 = vector.load %arg8[%c0_20, %c0_21, %c0_22] : memref<1x18x128xbf16, #tpu.memory_space<vmem>>, vector<1x16x128xbf16>
    %22 = vector.shape_cast %21 : vector<1x16x128xbf16> to vector<16x128xbf16>
    %c0_23 = arith.constant 0 : index
    %c1_24 = arith.constant 1 : index
    %c0_25 = arith.constant 0 : index
    %23 = vector.load %arg8[%c0_23, %c1_24, %c0_25] : memref<1x18x128xbf16, #tpu.memory_space<vmem>>, vector<1x16x128xbf16>
    %24 = vector.shape_cast %23 : vector<1x16x128xbf16> to vector<16x128xbf16>
    %c0_26 = arith.constant 0 : index
    %c2_27 = arith.constant 2 : index
    %c0_28 = arith.constant 0 : index
    %25 = vector.load %arg8[%c0_26, %c2_27, %c0_28] : memref<1x18x128xbf16, #tpu.memory_space<vmem>>, vector<1x16x128xbf16>
    %26 = vector.shape_cast %25 : vector<1x16x128xbf16> to vector<16x128xbf16>
    %27 = tpu.concatenate %22, %24, %26 in 1 : vector<16x128xbf16>, vector<16x128xbf16>, vector<16x128xbf16> -> vector<16x384xbf16>
    %c0_29 = arith.constant 0 : index
    %c0_30 = arith.constant 0 : index
    %28 = vector.load %arg4[%c0_29, %c0_30] : memref<384x128xbf16, #tpu.memory_space<vmem>>, vector<384x128xbf16>
    %cst_31 = arith.constant dense<0.000000e+00> : vector<16x128xf32>
    %29 = tpu.matmul %27, %28, %cst_31 {dimension_numbers = #tpu.dot_dimension_numbers<[1], [0], [0], [1], [0, 0, 1, 1], [], []>} : vector<16x384xbf16>, vector<384x128xbf16>, vector<16x128xf32> -> vector<16x128xf32>
    %c0_32 = arith.constant 0 : index
    %c0_33 = arith.constant 0 : index
    %30 = vector.load %arg5[%c0_32, %c0_33] : memref<1x128xf32, #tpu.memory_space<vmem>>, vector<1x128xf32>
    %31 = vector.broadcast %30 : vector<1x128xf32> to vector<16x128xf32>
    %32 = arith.addf %29, %31 : vector<16x128xf32>
    %cst_34 = arith.constant 0.000000e+00 : f32
    %33 = vector.broadcast %cst_34 : f32 to vector<16x128xf32>
    %34 = arith.maximumf %32, %33 : vector<16x128xf32>
    %35 = vector.extract_strided_slice %8 {offsets = [0, 128], sizes = [16, 128], strides = [1, 1]} : vector<16x256xf32> to vector<16x128xf32>
    %c0_35 = arith.constant 0 : index
    %c0_36 = arith.constant 0 : index
    %36 = vector.load %arg6[%c0_35, %c0_36] : memref<1x128xf32, #tpu.memory_space<vmem>>, vector<1x128xf32>
    %37 = vector.broadcast %36 : vector<1x128xf32> to vector<16x128xf32>
    %38 = arith.addf %35, %37 : vector<16x128xf32>
    %39 = arith.addf %34, %38 : vector<16x128xf32>
    %40 = vector.shape_cast %39 : vector<16x128xf32> to vector<1x16x128xf32>
    %c0_37 = arith.constant 0 : index
    %c0_38 = arith.constant 0 : index
    %c0_39 = arith.constant 0 : index
    %41 = vector.load %arg7[%c0_37, %c0_38, %c0_39] : memref<1x16x128xf32, #tpu.memory_space<vmem>>, vector<1x16x128xf32>
    tpu.vector_store %arg7[%c0_37, %c0_38, %c0_39], %40 {strides = array<i32>} : memref<1x16x128xf32, #tpu.memory_space<vmem>>, vector<1x16x128xf32>,
    return
  }
  func.func @transform_0(%arg0: i32) -> (i32, i32, i32) {
    %c0_i32 = arith.constant 0 : i32
    %c0_i32_0 = arith.constant 0 : i32
    %c0_i32_1 = arith.constant 0 : i32
    return %arg0, %c0_i32, %c0_i32_0 : i32, i32, i32
  }
  func.func @transform_1(%arg0: i32) -> (i32, i32) {
    %c0_i32 = arith.constant 0 : i32
    %c0_i32_0 = arith.constant 0 : i32
    %c0_i32_1 = arith.constant 0 : i32
    return %c0_i32, %c0_i32_0 : i32, i32
  }
  func.func @transform_2(%arg0: i32) -> (i32, i32) {
    %c0_i32 = arith.constant 0 : i32
    %c0_i32_0 = arith.constant 0 : i32
    %c0_i32_1 = arith.constant 0 : i32
    return %c0_i32, %c0_i32_0 : i32, i32
  }
  func.func @transform_3(%arg0: i32) -> (i32, i32) {
    %c0_i32 = arith.constant 0 : i32
    %c0_i32_0 = arith.constant 0 : i32
    %c0_i32_1 = arith.constant 0 : i32
    return %c0_i32, %c0_i32_0 : i32, i32
  }
  func.func @transform_4(%arg0: i32) -> (i32, i32) {
    %c0_i32 = arith.constant 0 : i32
    %c0_i32_0 = arith.constant 0 : i32
    %c0_i32_1 = arith.constant 0 : i32
    return %c0_i32, %c0_i32_0 : i32, i32
  }
  func.func @transform_5(%arg0: i32) -> (i32, i32) {
    %c0_i32 = arith.constant 0 : i32
    %c0_i32_0 = arith.constant 0 : i32
    %c0_i32_1 = arith.constant 0 : i32
    return %c0_i32, %c0_i32_0 : i32, i32
  }
  func.func @transform_6(%arg0: i32) -> (i32, i32, i32) {
    %c0_i32 = arith.constant 0 : i32
    %c0_i32_0 = arith.constant 0 : i32
    %c0_i32_1 = arith.constant 0 : i32
    return %arg0, %c0_i32, %c0_i32_0 : i32, i32, i32
  }
}

</mosaic_0001>

<bundles_post_ra>
// kernel: tpu_custom_call.1
= control target key start
LH: loop header
LB: loop body
LE: loop exit
PB: predicated region body
PF: predicated region fallthrough
CT: control target
= control target key end

     0   :  { %11 = vsyncpa [#allocation4], 0  ;;  %s1637_s0 = inlined_call_operand.vmem [shape: bf16[2,18,64], index: 0, kind: input, shape index: {}]   ;;  %s1638_s1 = inlined_call_operand.hbm [shape: bf16[192,256], index: 1, kind: input, shape index: {}]   ;;  %s1639_s2 = inlined_call_operand.vmem [shape: f32[1,128], index: 2, kind: input, shape index: {}]   ;;  %s1640_s3 = inlined_call_operand.hbm [shape: bf16[384,128], index: 3, kind: input, shape index: {}]   ;;  %s1641_s4 = inlined_call_operand.vmem [shape: f32[1,128], index: 4, kind: input, shape index: {}]   ;;  %s1642_s5 = inlined_call_operand.vmem [shape: f32[1,128], index: 5, kind: input, shape index: {}]   ;;  %s1643_s6 = inlined_call_operand.hbm [shape: f32[2,16,128], index: 6, kind: output, shape index: {}]  }
   0x1   :  { %12 = vsyncpa [#allocation7], 0 }
   0x2   :  { %13 = vsyncpa [#allocation5], 0 }
   0x3   :  { %15 = vsyncpa [#allocation5 + $0x1], 0  ;;  %s1480_s21 = smov 0   ;;  %s1482_s22 = smov 0  }
   0x4   :  { %s1484_s23 = smov 0   ;;  %s1486_s24 = smov 0  }
   0x5 LB: > { %s1501_s25 = sadd.s32 4294967295, %s1434_s24   ;;  %s961_s26 = sadd.s32 4294967294, %s1434_s24   ;;  %s1434_s24 = sphi %s1486_s24, %s1652_s24   ;;  %s1430_s23 = sphi %s1484_s23, %s1651_s23   ;;  %s1426_s22 = sphi %s1482_s22, %s1650_s22   ;;  %s1422_s21 = sphi %s1480_s21, %s1649_s21  }
   0x6   : > { %s1505_s27 = sadd.s32 1, %s1434_s24   ;;  %s159_s28 = sadd.s32 1, %s1430_s23 }
   0x7   : > { %s156_s29 = ssub.s32 %s1434_s24, %s1505_s27  ;;  %p169_p0 = scmp.ne.s32.totalorder %s1430_s23, %s1426_s22 }
   0x8   : > { %p157_p1 = scmp.eq.s32.totalorder %s156_s29, 0  ;;  %p170_p2 = scmp.eq.s32.totalorder %s1501_s25, 1 }
   0x9   : > { %p175_p3 = scmp.ne.s32.totalorder %s1426_s22, %s1422_s21  ;;  %p176_p4 = scmp.eq.s32.totalorder %s961_s26, 1 }
   0xa   : > { %s1516_s30 = scalar_select %p157_p1, %s1430_s23, %s159_s28  }
   0xb   : > { %p1518_p5 = por %p170_p2, %p169_p0  ;;  %p1522_p6 = por %p176_p4, %p175_p3 }
   0xc   : > { %p962_p7 = scmp.ge.s32.totalorder %s1434_s24, 1  ;;  %p183_p8 = scmp.lt.s32.totalorder %s1434_s24, 3 }
   0xd   : > { %p1255_p9 = scmp.eq.s32.totalorder %s1501_s25, 0  ;;  %s194_s12 = sshll.u32 %s1638_s1, 4  ;;  %s195_s12 = int_to_ptr.hbm [resolvable:$true] %s194_s12 }
   0xe   : > { %p1529_p10 = pnand %p962_p7, %p183_p8  ;;  %s1436_s13 = smov [#allocation3]  }
   0xf   : > { %s196_s14 = sshll.u32 %s1436_s13, 4  ;;  %s211_s17 = sshll.u32 %s1640_s3, 4  ;;  %s197_s14 = int_to_ptr.vmem [resolvable:$true] %s196_s14  ;;  %s212_s17 = int_to_ptr.hbm [resolvable:$true] %s211_s17 }
  0x10   : > { %p1244_p11 = pneg %p1529_p10  ;;  %s1437_s18 = smov 128  }
  0x11   : > { %s1438_s19 = smov 8   ;;  %s1439_s20 = smov [#allocation6]  }
  0x12   : > { %p1245_p12 = pnand %p1255_p9, %p1244_p11  ;;  %s213_s26 = sshll.u32 %s1439_s20, 4  ;;  %s214_s26 = int_to_ptr.vmem [resolvable:$true] %s213_s26 }
  0x13   : > { %s1440_s28 = smov 64   ;;  %s1441_s29 = smov 4  }
  0x14   : > { %1247 = dma.hbm_to_vmem [thread:$0]  (!%p1245_p12), %s195_s12, 3072, %s197_s14, [#allocation4], %s1437_s18, %s1437_s18, %s1438_s19  }
  0x15   : > { %1250 = dma.hbm_to_vmem [thread:$0]  (!%p1245_p12), %s212_s17, 3072, %s214_s26, [#allocation7], %s1440_s28, %s1440_s28, %s1441_s29  }
  0x16   : > { %243 = sbr.rel (%p1529_p10) target bundleno = 482 (0x1e2), region = 44 }
  0x1b   : > { %1409 = dma.done.wait (%p1255_p9), [#allocation4], 3072  }
  0x1c   : > { %1411 = vsyncadd (%p1255_p9), [#allocation4], 4294964224 }
  0x1d   : > { %1413 = dma.done.wait (%p1255_p9), [#allocation7], 3072  }
  0x1e   : > { %1415 = vsyncadd (%p1255_p9), [#allocation7], 4294964224  ;;  %p279_p13 = scmp.lt.s32.totalorder %s1501_s25, 1  ;;  %v1029_v2 = vld [vmem:[#allocation3 + $0x70] sm:$0xf]  ;;  %s1442_s14 = smov 64  }
  0x1f   : > { %v1185_v6 = vld [vmem:[#allocation3 + $0x74] sm:$0xf0]  ;;  %v1184_v7 = vld [vmem:[#allocation3 + $0x74] sm:$0xf]  ;;  %v1031_v9 = vld [vmem:[#allocation3 + $0x78] sm:$0xf0] }
  0x20   : > { %s280_s10 = scalar_select %p279_p13, %s1501_s25, 1  ;;  %v1030_v8 = vor.u32 %v1185_v6, %v1029_v2  ;;  %v1021_v10 = vld [vmem:[#allocation3 + $0x60] sm:$0xf]  ;;  %v1183_v11 = vld [vmem:[#allocation3 + $0x64] sm:$0xf0]  ;;  %v1034_v14 = vor.u32 %v1184_v7, %v1031_v9  ;;  %vm315_vm1 = vcmask 1046528  }
  0x21   : > { %v1182_v15 = vld [vmem:[#allocation3 + $0x64] sm:$0xf]  ;;  %v1023_v16 = vld [vmem:[#allocation3 + $0x68] sm:$0xf0]  ;;  %v1022_v17 = vor.u32 %v1183_v11, %v1021_v10  ;;  %v1013_v18 = vld [vmem:[#allocation3 + $0x50] sm:$0xf] }
  0x22   : > { %s1233_s11 = smul.u32 12, %s280_s10  ;;  %470 = vmatpush.bf16.msra.mxu0 %v1030_v8  ;;  %v1061_v19 = vld [vmem:[#allocation3 + $0xb0] sm:$0xf]  ;;  %498 = vmatpush.bf16.msra.mxu2 %v1034_v14  ;;  %v1026_v22 = vor.u32 %v1182_v15, %v1023_v16  ;;  %v1181_v23 = vld [vmem:[#allocation3 + $0x54] sm:$0xf0]  ;;  %vm319_vm2 = vcmask 523264  }
  0x23   : > { %v1193_v24 = vld [vmem:[#allocation3 + $0xb4] sm:$0xf0]  ;;  %vm297_vm0 = vsmask.f32 7424  ;;  %v1180_v26 = vld [vmem:[#allocation3 + $0x54] sm:$0xf]  ;;  %v1014_v31 = vor.u32 %v1181_v23, %v1013_v18 }
  0x24   : > { %s1558_s13 = scalar_lea.vmem %s1637_s0, %s1233_s11  ;;  %v1062_v25 = vor.u32 %v1193_v24, %v1061_v19  ;;  %v1015_v27 = vld [vmem:[#allocation3 + $0x58] sm:$0xf0]  ;;  %v1053_v29 = vld [vmem:[#allocation3 + $0xa0] sm:$0xf]  ;;  %v1191_v30 = vld [vmem:[#allocation3 + $0xa4] sm:$0xf0] }
  0x25   : > { %v1561_v0 = vld [vmem:[%s1558_s13] sm:$0xff]   ;;  %v287_v1 = vld [vmem:[%s1558_s13 + $0x8] sm:$0x1]  ;;  %v1005_v32 = vld [vmem:[#allocation3 + $0x40] sm:$0xf]  ;;  %v1054_v33 = vor.u32 %v1191_v30, %v1053_v29  ;;  %v1018_v35 = vor.u32 %v1180_v26, %v1015_v27  ;;  %vm534_vm3 = vcmask 1040384  }
  0x26   : > { %v295_v3 = vunpack.c.l.b16 %v287_v1  ;;  %v299_v4 = vshrl.u32 %v1561_v0, 16  ;;  %v301_v5 = vshll.u32 %v1561_v0, 16  ;;  %471 = vmatpush.bf16.msra.mxu0 %v1022_v17  ;;  %488 = vmatpush.bf16.msra.mxu1 %v1062_v25  ;;  %v1179_v36 = vld [vmem:[#allocation3 + $0x44] sm:$0xf0]  ;;  %v1045_v37 = vld [vmem:[#allocation3 + $0x90] sm:$0xf] }
  0x27   : > { %499 = vmatpush.bf16.msra.mxu2 %v1026_v22  ;;  %v1189_v38 = vld [vmem:[#allocation3 + $0x94] sm:$0xf0]  ;;  %v1178_v39 = vld [vmem:[#allocation3 + $0x44] sm:$0xf]  ;;  %v1007_v40 = vld [vmem:[#allocation3 + $0x48] sm:$0xf0]  ;;  %v1006_v44 = vor.u32 %v1179_v36, %v1005_v32 }
  0x28   : > { %v1566_v12 = vpack.c.b16 %v295_v3, %v295_v3  ;;  %v303_v13 = vrot.slane %v301_v5, 1  ;;  %v1192_v41 = vld [vmem:[#allocation3 + $0xb4] sm:$0xf]  ;;  %v997_v42 = vld [vmem:[#allocation3 + $0x30] sm:$0xf]  ;;  %v1046_v46 = vor.u32 %v1189_v38, %v1045_v37  ;;  %v1010_v50 = vor.u32 %v1178_v39, %v1007_v40  ;;  %v1209_v36 = vld [vmem:[#allocation6 + $0x78] sm:$0xff] }
  0x29   : > { %v1063_v43 = vld [vmem:[#allocation3 + $0xb8] sm:$0xf0]  ;;  %v1177_v45 = vld [vmem:[#allocation3 + $0x34] sm:$0xf0]  ;;  %v1176_v47 = vld [vmem:[#allocation3 + $0x34] sm:$0xf] }
  0x2a   : > { %v304_v20 = vor.u32 %v303_v13, %v299_v4  ;;  %v306_v21 = vshll.u32 %v1566_v12, 16  ;;  %472 = vmatpush.bf16.msra.mxu0 %v1014_v31  ;;  %489 = vmatpush.bf16.msra.mxu1 %v1054_v33  ;;  %v1066_v48 = vor.u32 %v1192_v41, %v1063_v43  ;;  %v1037_v49 = vld [vmem:[#allocation3 + $0x80] sm:$0xf]  ;;  %v1187_v51 = vld [vmem:[#allocation3 + $0x84] sm:$0xf0]  ;;  %v317_v59 = vrot.slane %v1566_v12, 1 }
  0x2b   : > { %500 = vmatpush.bf16.msra.mxu2 %v1018_v35  ;;  %v1190_v52 = vld [vmem:[#allocation3 + $0xa4] sm:$0xf]  ;;  %v1055_v53 = vld [vmem:[#allocation3 + $0xa8] sm:$0xf0]  ;;  %v999_v54 = vld [vmem:[#allocation3 + $0x38] sm:$0xf0]  ;;  %v998_v60 = vor.u32 %v1177_v45, %v997_v42  ;;  %v1038_v62 = vor.u32 %v1187_v51, %v1037_v49 }
  0x2c   : > { %v308_v28 = vrot.slane %v306_v21, 1  ;;  %516 = vmatpush.bf16.msra.mxu3 %v1066_v48  ;;  %v1058_v55 = vor.u32 %v1190_v52, %v1055_v53  ;;  %v1227_v56 = vld [vmem:[%s1558_s13] sm:$0xf0]  ;;  %v1228_v57 = vld [vmem:[%s1558_s13] sm:$0xe]  ;;  %v1002_v2 = vor.u32 %v1176_v47, %v999_v54  ;;  %v1199_v35 = vld [vmem:[#allocation6 + $0x28] sm:$0xff] }
  0x2d   : > { %v1229_v58 = vor.u32 %v1228_v57, %v1227_v56  ;;  %v989_v61 = vld [vmem:[#allocation3 + $0x20] sm:$0xf]  ;;  %v1188_v63 = vld [vmem:[#allocation3 + $0x94] sm:$0xf]  ;;  %v1047_v1 = vld [vmem:[#allocation3 + $0x98] sm:$0xf0] }
  0x2e   : > { %v309_v34 = vsel %vm297_vm0, %v304_v20, %v308_v28  ;;  %473 = vmatpush.bf16.msra.mxu0 %v1006_v44  ;;  %490 = vmatpush.bf16.msra.mxu1 %v1046_v46  ;;  %v1175_v3 = vld [vmem:[#allocation3 + $0x24] sm:$0xf0]  ;;  %v1174_v4 = vld [vmem:[#allocation3 + $0x24] sm:$0xf]  ;;  %v991_v6 = vld [vmem:[#allocation3 + $0x28] sm:$0xf0]  ;;  %v1050_v7 = vor.u32 %v1188_v63, %v1047_v1 }
  0x2f   : > { %310 = vrot.lane.b32.xlu0 %v309_v34, %s1442_s14  ;;  %501 = vmatpush.bf16.msra.mxu2 %v1010_v50  ;;  %v316_v5 = vrot.slane %v1229_v58, 1  ;;  %v1186_v8 = vld [vmem:[#allocation3 + $0x84] sm:$0xf]  ;;  %v1039_v9 = vld [vmem:[#allocation3 + $0x88] sm:$0xf0]  ;;  %v990_v10 = vor.u32 %v1175_v3, %v989_v61  ;;  %v994_v12 = vor.u32 %v1174_v4, %v991_v6  ;;  %v1201_v28 = vld [vmem:[#allocation6 + $0x38] sm:$0xff] }
  0x30   : > { %517 = vmatpush.bf16.msra.mxu3 %v1058_v55  ;;  %v981_v13 = vld [vmem:[#allocation3 + $0x10] sm:$0xf]  ;;  %v1173_v14 = vld [vmem:[#allocation3 + $0x14] sm:$0xf0]  ;;  %v1172_v15 = vld [vmem:[#allocation3 + $0x14] sm:$0xf]  ;;  %v1042_v17 = vor.u32 %v1186_v8, %v1039_v9 }
  0x31   : > { %v318_v11 = vsel %vm315_vm1, %v316_v5, %v317_v59  ;;  %v983_v16 = vld [vmem:[#allocation3 + $0x18] sm:$0xf0]  ;;  %v982_v18 = vor.u32 %v1173_v14, %v981_v13  ;;  %v973_v20 = vld [vmem:[#allocation3] sm:$0xf]  ;;  %v1171_v21 = vld [vmem:[#allocation3 + $0x4] sm:$0xf0] }
  0x32   : > { %474 = vmatpush.bf16.msra.mxu0 %v998_v60  ;;  %491 = vmatpush.bf16.msra.mxu1 %v1038_v62  ;;  %v986_v19 = vor.u32 %v1172_v15, %v983_v16  ;;  %v1170_v22 = vld [vmem:[#allocation3 + $0x4] sm:$0xf]  ;;  %v975_v23 = vld [vmem:[#allocation3 + $0x8] sm:$0xf0]  ;;  %v974_v24 = vor.u32 %v1171_v21, %v973_v20  ;;  %v1200_v29 = vld [vmem:[#allocation6 + $0x30] sm:$0xff]  ;;  %vm569_vm8 = vcmask 1043456  }
  0x33   : > { %502 = vmatpush.bf16.msra.mxu2 %v1002_v2  ;;  %v978_v25 = vor.u32 %v1170_v22, %v975_v23  ;;  %vm535_vm4 = vsmask.f32 256  ;;  %v537_v31 = vld [vmem:[#allocation2] sm:$0x1]  ;;  %vm540_vm6 = vsmask.f32 7938 }
  0x34   : > { %518 = vmatpush.bf16.msra.mxu3 %v1050_v7  ;;  %vm1579_vm5 = vmand %vm534_vm3, %vm535_vm4  ;;  %v542_v32 = vld [vmem:[#allocation2 + $0x8] sm:$0x1]  ;;  %v1216_v37 = vld [vmem:[#allocation6 + $0xb0] sm:$0xff]  ;;  %vm547_vm10 = vsmask.f32 4368  ;;  %s276_s19 = sand.u32 1, %s1426_s22  }
  0x35   : > { %1067 = vmatmul.msk.bf16.vlgmr.msra.gmra.mxu1 %vm319_vm2, %v318_v11  ;;  %v538_v33 = vsel %vm1579_vm5, 0, %v537_v31  ;;  %vm541_vm7 = vmand %vm534_vm3, %vm540_vm6  ;;  %v1217_v34 = vld [vmem:[#allocation6 + $0xb8] sm:$0xff]  ;;  %v1198_v38 = vld [vmem:[#allocation6 + $0x20] sm:$0xff]  ;;  %s969_s28 = sshll.u32 %s276_s19, 4  ;;  %s1218_s29 = sshll.u32 %s1501_s25, 4 }
  0x36   : > { %475 = vmatpush.bf16.msra.mxu0 %v990_v10  ;;  %807 = vmatpush.bf16.msrb.mxu1 %v1201_v28  ;;  %539 = vst [vmem:[#allocation2] sm:$0x1] %v538_v33  ;;  %v1208_v39 = vld [vmem:[#allocation6 + $0x70] sm:$0xff]  ;;  %v1215_v40 = vld [vmem:[#allocation6 + $0xa8] sm:$0xff]  ;;  %v1197_v41 = vld [vmem:[#allocation6 + $0x18] sm:$0xff]  ;;  %s873_s12 = scalar_lea.hbm %s1643_s6, %s1218_s29  ;;  %s278_s9 = scalar_lea.vmem [#allocation8], %s969_s28 }
  0x37   : > { %503 = vmatpush.bf16.msra.mxu2 %v994_v12  ;;  %v1207_v42 = vld [vmem:[#allocation6 + $0x68] sm:$0xff]  ;;  %v1214_v43 = vld [vmem:[#allocation6 + $0xa0] sm:$0xff]  ;;  %v1196_v44 = vld [vmem:[#allocation6 + $0x10] sm:$0xff]  ;;  %s874_s13 = sshll.u32 %s278_s9, 4  ;;  %s876_s14 = sshll.u32 %s873_s12, 4  ;;  %s875_s13 = int_to_ptr.vmem [resolvable:$true] %s874_s13  ;;  %s877_s14 = int_to_ptr.hbm [resolvable:$true] %s876_s14 }
  0x38   : > { %519 = vmatpush.bf16.msra.mxu3 %v1042_v17  ;;  %v1206_v45 = vld [vmem:[#allocation6 + $0x60] sm:$0xff]  ;;  %v1213_v46 = vld [vmem:[#allocation6 + $0x98] sm:$0xff]  ;;  %v1195_v47 = vld [vmem:[#allocation6 + $0x8] sm:$0xff]  ;;  %s862_s25 = scalar_lea.sflag [#allocation5], %s276_s19  ;;  %s1378_s15 = sshra.s32 %s877_s14, 4  ;;  %s1379_s15 = int_to_ptr.hbm [resolvable:$true] %s1378_s15 }
  0x39   : > { %v1205_v48 = vld [vmem:[#allocation6 + $0x58] sm:$0xff]  ;;  %v1212_v49 = vld [vmem:[#allocation6 + $0x90] sm:$0xff]  ;;  %v1194_v50 = vld [vmem:[#allocation6] sm:$0xff]  ;;  %s1380_s16 = scalar_lea.hbm %s1379_s15, 16  ;;  %s1384_s20 = scalar_lea.hbm %s1643_s6, 32 }
  0x3a   : > { %476 = vmatpush.bf16.msra.mxu0 %v982_v18  ;;  %808 = vmatpush.bf16.msrb.mxu1 %v1200_v29  ;;  %v1204_v51 = vld [vmem:[#allocation6 + $0x50] sm:$0xff]  ;;  %v1211_v54 = vld [vmem:[#allocation6 + $0x88] sm:$0xff]  ;;  %v1210_v59 = vld [vmem:[#allocation6 + $0x80] sm:$0xff]  ;;  %p1381_p0 = scmp.ne.s32.totalorder %s1379_s15, %s1380_s16  ;;  %p1385_p3 = scmp.lt.s32.totalorder %s1379_s15, %s1643_s6 }
  0x3b   : > { %504 = vmatpush.bf16.msra.mxu2 %v986_v19  ;;  %1068 = vmatmul.msk.bf16.vlgmr.msra.gmra.mxu3 %vm319_vm2, %v318_v11  ;;  %v1301_v53 = vld [vmem:[%s1639_s2] ss:$0 sm:$0xff]  ;;  %v1203_v57 = vld [vmem:[#allocation6 + $0x48] sm:$0xff]  ;;  %v1202_v60 = vld [vmem:[#allocation6 + $0x40] sm:$0xff]  ;;  %p1386_p4 = scmp.lt.s32.totalorder %s1384_s20, %s1380_s16 }
  0x3c   : > { %821 = vmatpush.bf16.msrb.mxu3 %v1209_v36  ;;  %vm570_vm9 = vmand %vm569_vm8, %vm540_vm6  ;;  %p1382_p1 = pnand %p1381_p0, %p1518_p5 }
  0x3d   : > { %v571_v7 = vld [vmem:[#allocation2] sm:$0xf]  ;;  %vm548_vm11 = vmor %vm535_vm4, %vm547_vm10  ;;  %p1387_p7 = por %p1386_p4, %p1385_p3 }
  0x3e   : > { %477 = vmatpush.bf16.msra.mxu0 %v974_v24  ;;  %809 = vmatpush.bf16.msrb.mxu1 %v1199_v35  ;;  %p1383_p2 = pneg %p1382_p1 }
  0x3f   : > { %505 = vmatpush.bf16.msra.mxu2 %v978_v25 }
  0x40   : > { %822 = vmatpush.bf16.msrb.mxu3 %v1208_v39  ;;  %p1388_p8 = pnand %p1387_p7, %p1383_p2 }
  0x42   : > { %835 = vmatpush.bf16.msrb.mxu0 %v1217_v34  ;;  %810 = vmatpush.bf16.msrb.mxu1 %v1198_v38 }
  0x44   : > { %823 = vmatpush.bf16.msrb.mxu3 %v1207_v42 }
  0x46   : > { %836 = vmatpush.bf16.msrb.mxu0 %v1216_v37  ;;  %811 = vmatpush.bf16.msrb.mxu1 %v1197_v41 }
  0x48   : > { %824 = vmatpush.bf16.msrb.mxu3 %v1206_v45 }
  0x4a   : > { %837 = vmatpush.bf16.msrb.mxu0 %v1215_v40  ;;  %812 = vmatpush.bf16.msrb.mxu1 %v1196_v44  ;;  %v1303_v40 = vld [vmem:[%s1641_s4] ss:$0 sm:$0xff] }
  0x4c   : > { %825 = vmatpush.bf16.msrb.mxu3 %v1205_v48 }
  0x4e   : > { %838 = vmatpush.bf16.msrb.mxu0 %v1214_v43  ;;  %813 = vmatpush.bf16.msrb.mxu1 %v1195_v47 }
  0x50   : > { %826 = vmatpush.bf16.msrb.mxu3 %v1204_v51 }
  0x52   : > { %839 = vmatpush.bf16.msrb.mxu0 %v1213_v46  ;;  %814 = vmatpush.bf16.msrb.mxu1 %v1194_v50  ;;  %v1302_v46 = vld [vmem:[%s1642_s5] ss:$0 sm:$0xff] }
  0x54   : > { %827 = vmatpush.bf16.msrb.mxu3 %v1203_v57 }
  0x56   : > { %840 = vmatpush.bf16.msrb.mxu0 %v1212_v49 }
  0x58   : > { %828 = vmatpush.bf16.msrb.mxu3 %v1202_v60 }
  0x5a   : > { %841 = vmatpush.bf16.msrb.mxu0 %v1211_v54 }
  0x5e   : > { %842 = vmatpush.bf16.msrb.mxu0 %v1210_v59 }
  0xa1   : > { %v311_v26 = vpop.permute.xlu0 %310 }
  0xa2   : > { %v321_v27 = vsel %vm319_vm2, %v1561_v0, %v311_v26  ;;  %v543_v0 = vsel %vm541_vm7, 0, %v542_v32 }
  0xa3   : > { %478 = vmatmul.bf16.vlgmr.msra.gmra.mxu0 %v321_v27  ;;  %506 = vmatmul.bf16.vlgmr.msra.gmra.mxu2 %v321_v27  ;;  %544 = vst [vmem:[#allocation2 + $0x8] sm:$0x1] %v543_v0 }
  0xaa   : > { %v575_v15 = vld [vmem:[#allocation2 + $0x8] sm:$0x1] }
  0xb2   : > { %v493_v52 = vpop.f32.mrf.mxu1 }
  0xba   : > { %v495_v63 = vpop.f32.mrf.mxu1 }
  0xbe   : > { %v521_v37 = vpop.f32.mrf.mxu3 }
  0xc6   : > { %v523_v38 = vpop.f32.mrf.mxu3 }
 0x120   : > { %v479_v55 = vpop.f32.mrf.mxu0 }
 0x121   : > { %v494_v56 = vadd.f32 %v493_v52, %v479_v55 }
 0x123   : > { %v530_v58 = vadd.f32 %v1301_v53, %v494_v56 }
 0x125   : > { %v532_v61 = vmax.f32 %v530_v58, 0.0 }
 0x126   : > { %v507_v41 = vpop.f32.mrf.mxu2 }
 0x127   : > { %v545_v62 = vpack.c.bf16 %v532_v61, %v532_v61  ;;  %v522_v45 = vadd.f32 %v521_v37, %v507_v41 }
 0x128   : > { %v481_v1 = vpop.f32.mrf.mxu0 }
 0x129   : > { %v550_v2 = vshrl.u32 %v545_v62, 16  ;;  %v496_v3 = vadd.f32 %v495_v63, %v481_v1  ;;  %v553_v5 = vshll.u32 %v545_v62, 16  ;;  %v855_v50 = vadd.f32 %v1302_v46, %v522_v45 }
 0x12b   : > { %v552_v4 = vrot.slane %v550_v2, 7  ;;  %v531_v6 = vadd.f32 %v1301_v53, %v496_v3 }
 0x12d   : > { %v555_v8 = vor.u32 %v553_v5, %v552_v4  ;;  %v533_v9 = vmax.f32 %v531_v6, 0.0  ;;  %v556_v16 = vrot.slane %v552_v4, 4 }
 0x12e   : > { %v509_v52 = vpop.f32.mrf.mxu2 }
 0x12f   : > { %v572_v10 = vsel %vm570_vm9, %v555_v8, %v571_v7  ;;  %v546_v11 = vpack.c.bf16 %v533_v9, %v533_v9  ;;  %v524_v56 = vadd.f32 %v523_v38, %v509_v52 }
 0x130   : > { %573 = vst [vmem:[#allocation2] sm:$0xf] %v572_v10 }
 0x131   : > { %v558_v12 = vshrl.u32 %v546_v11, 16  ;;  %v561_v14 = vshll.u32 %v546_v11, 16  ;;  %v856_v60 = vadd.f32 %v1302_v46, %v524_v56 }
 0x133   : > { %v560_v13 = vrot.slane %v558_v12, 7 }
 0x135   : > { %v563_v17 = vor.u32 %v561_v14, %v560_v13  ;;  %v565_v18 = vrot.slane %v560_v13, 4 }
 0x137   : > { %v564_v19 = vsel %vm548_vm11, %v556_v16, %v563_v17  ;;  %v576_v20 = vsel %vm1579_vm5, %v565_v18, %v575_v15  ;;  %v1231_v25 = vld [vmem:[#allocation2] sm:$0xe] }
 0x138   : > { %574 = vst [vmem:[#allocation2 + $0x4] sm:$0xf] %v564_v19 }
 0x139   : > { %577 = vst [vmem:[#allocation2 + $0x8] sm:$0x1] %v576_v20 }
 0x13f   : > { %v1224_v21 = vld [vmem:[#allocation2] sm:$0xff]  }
 0x140   : > { %v1230_v22 = vld [vmem:[#allocation2] sm:$0xf0]  ;;  %v594_v23 = vshll.u32 %v1224_v21, 16  ;;  %815 = vmatmul.bf16.vlgmr.msrb.gmra.mxu1 %v1224_v21  ;;  %v580_v24 = vld [vmem:[#allocation2 + $0x8] sm:$0x1]  ;;  %v592_v31 = vshrl.u32 %v1224_v21, 16 }
 0x141   : > { %v589_v26 = vunpack.c.l.b16 %v580_v24  ;;  %v1232_v27 = vor.u32 %v1231_v25, %v1230_v22 }
 0x142   : > { %v596_v28 = vrot.slane %v594_v23, 1 }
 0x143   : > { %v590_v29 = vpack.c.b16 %v589_v26, %v589_v26  ;;  %v607_v32 = vrot.slane %v1232_v27, 1 }
 0x144   : > { %v597_v34 = vor.u32 %v596_v28, %v592_v31 }
 0x145   : > { %v608_v33 = vrot.slane %v590_v29, 1  ;;  %v599_v0 = vshll.u32 %v590_v29, 16 }
 0x147   : > { %v609_v30 = vsel %vm315_vm1, %v607_v32, %v608_v33  ;;  %v601_v35 = vrot.slane %v599_v0, 1 }
 0x148   : > { %843 = vmatmul.bf16.vlgmr.msrb.gmra.mxu0 %v609_v30 }
 0x149   : > { %v602_v36 = vsel %vm297_vm0, %v597_v34, %v601_v35 }
 0x14a   : > { %829 = vmatmul.bf16.vlgmr.msrb.gmra.mxu3 %v602_v36 }
 0x1bd   : > { %v816_v39 = vpop.f32.mrf.mxu1 }
 0x1be   : > { %v817_v42 = vadd.f32 %v1303_v40, %v816_v39 }
 0x1c5   : > { %v844_v43 = vpop.f32.mrf.mxu0  ;;  %v818_v49 = vpop.f32.mrf.mxu1 }
 0x1c6   : > { %v819_v53 = vadd.f32 %v1303_v40, %v818_v49 }
 0x1cd   : > { %v830_v44 = vpop.f32.mrf.mxu3  ;;  %v846_v58 = vpop.f32.mrf.mxu0 }
 0x1ce   : > { %v831_v47 = vadd.f32 %v830_v44, %v817_v42 }
 0x1d0   : > { %v845_v48 = vadd.f32 %v844_v43, %v831_v47 }
 0x1d2   : > { %v849_v51 = vmax.f32 %v845_v48, 0.0 }
 0x1d4   : > { %v857_v54 = vadd.f32 %v855_v50, %v849_v51 }
 0x1d5   : > { %v832_v55 = vpop.f32.mrf.mxu3 }
 0x1d6   : > { %859 = vst [vmem:[%s278_s9] sm:$0xff] %v857_v54  ;;  %v833_v57 = vadd.f32 %v832_v55, %v819_v53 }
 0x1d8   : > { %v847_v59 = vadd.f32 %v846_v58, %v833_v57 }
 0x1da   : > { %v850_v61 = vmax.f32 %v847_v59, 0.0 }
 0x1dc   : > { %v858_v62 = vadd.f32 %v856_v60, %v850_v61 }
 0x1de   : > { %860 = vst [vmem:[%s278_s9 + $0x8] sm:$0xff] %v858_v62 }
 0x1df   : > { %1391 = shalt.err (!%p1388_p8)
}
 0x1e0   : > { %s1443_s19 = smov 128   ;;  %s1444_s29 = smov 8  }
 0x1e1   : > { %1242 = dma.vmem_to_hbm [thread:$0]  (%p1518_p5), %s875_s13, 256, %s877_s14, %s862_s25, %s1443_s19, %s1443_s19, %s1444_s29  }
 0x1e2 PF: > { %p1259_p9 = scmp.ge.s32.totalorder %s1434_s24, 2  ;;  %s891_s10 = sand.u32 1, %s1422_s21  }
 0x1e3   : > { %s892_s11 = scalar_lea.sflag [#allocation5], %s891_s10 }
 0x1e4   : > { %p1252_p10 = pnand %p1259_p9, %p1522_p6 }
 0x1e6   : > { %p1253_p11 = pneg %p1252_p10 }
 0x1e8   : > { %1417 = dma.done.wait (%p1253_p11), %s892_s11, 256  }
 0x1e9   : > { %1419 = vsyncadd (%p1253_p11), %s892_s11, 4294967040  ;;  %p18_p12 = scmp.ge.s32.totalorder %s1505_s27, 4   ;;  %s1649_s21 = smov %s1426_s22 }
 0x1ea   : > { %s1650_s22 = smov %s1430_s23  ;;  %s1651_s23 = smov %s1516_s30 }
 0x1eb   : > { %s1652_s24 = smov %s1505_s27  ;;  %20 = sbr.rel (!%p18_p12) target bundleno = 5 (0x5), region = 88 }
 0x1f0   :  { %898 = vsyncpa [#allocation4], 1 }
 0x1f1   :  { %900 = vsyncpa [#allocation4 + $0x1], 1 }
 0x1f2   :  { %901 = vsyncpa [#allocation7], 1 }
 0x1f3   :  { %902 = vsyncpa [#allocation5], 1 }
 0x1f4   :  { %904 = vsyncpa [#allocation5 + $0x1], 1 }

</bundles_post_ra>
